<compile_context>
chip_gen: v5e
topology: v5e:2x2
jax: 0.10.0
libtpu: 0.0.40
codegen_flags: <defaults>
</compile_context>

<pallas_src>
import functools
import math

import jax
import jax.numpy as jnp
from jax.experimental import pallas as pl
from jax.experimental.pallas import tpu as pltpu


def self_attention_kernel(
    q_ref, k_ref, v_ref, wu_ref, bu_ref,
    o_ref,
    m_scr, l_scr, acc_scr,
    *, compute_dtype,
):
    ki = pl.program_id(2)
    nk = pl.num_programs(2)

    # ---- init accumulators: once per (batch, q-tile) ------------------------
    @pl.when(ki == 0)
    def _():
        m_scr[...] = jnp.full(m_scr.shape, -jnp.inf, dtype=m_scr.dtype)
        l_scr[...] = jnp.zeros(l_scr.shape, dtype=l_scr.dtype)
        acc_scr[...] = jnp.zeros(acc_scr.shape, dtype=acc_scr.dtype)

    # Pre-projected, pre-scaled tiles (projections hoisted to the wrapper).
    q = q_ref[0]     # (heads, tq, s) bf16, already multiplied by 1/sqrt(k)
    kh = k_ref[0]    # (heads, tk, s) bf16
    vh = v_ref[0]    # (heads, tk, s) bf16

    # ---- scores + online softmax (flash-style over key tiles) ---------------
    sc = jnp.einsum("hqs,hks->hqk", q, kh,
                    preferred_element_type=jnp.float32)              # (h, tq, tk) f32
    m_prev = m_scr[...]
    m_new = jnp.maximum(m_prev, jnp.max(sc, axis=-1, keepdims=True))
    alpha = jnp.exp(m_prev - m_new)
    p = jnp.exp(sc - m_new)
    l_scr[...] = alpha * l_scr[...] + jnp.sum(p, axis=-1, keepdims=True)
    acc_scr[...] = alpha * acc_scr[...] + jnp.einsum(
        "hqk,hks->hqs", p.astype(compute_dtype), vh,
        preferred_element_type=jnp.float32)
    m_scr[...] = m_new

    # ---- finalize: normalize, unify heads, add bias --------------------------
    @pl.when(ki == nk - 1)
    def _():
        out_h = acc_scr[...] * pl.reciprocal(l_scr[...], approx=True)    # (h, tq, s) f32
        att = jnp.einsum("hqs,hsk->hqk", out_h.astype(compute_dtype), wu_ref[...],
                         preferred_element_type=jnp.float32)             # (h, tq, k)
        attended = jnp.sum(att, axis=0) + bu_ref[...]                    # (tq, k)
        o_ref[0] = attended.astype(o_ref.dtype)


def _pick_tile(t, requested):
    if requested is not None:
        return requested
    for cand in (256, 128, 64, 32, 16, 8):
        if t % cand == 0:
            return cand
    return t


def self_attention(x, params, heads, *, q_tile=None, k_tile=None,
                   compute_dtype=jnp.bfloat16,
                   vmem_limit_bytes=48 * 1024 * 1024):
    b, t, k = x.shape
    assert k % heads == 0
    s = k // heads
    wq, wk, wv, wu, bu = params
    scale = 1.0 / math.sqrt(k)

    # ---- projections hoisted out of the kernel (plain XLA, one-time cost) ---
    # Q has the softmax scale folded in; all slabs are (b, heads, t, s) bf16.
    def project(w, apply_scale=False):
        y = x @ w                                                  # f32 (b, t, k)
        if apply_scale:
            y = y * scale
        return y.reshape(b, t, heads, s).transpose(0, 2, 1, 3).astype(compute_dtype)

    q_h = project(wq, apply_scale=True)
    k_h = project(wk)
    v_h = project(wv)

    # Resident unifyheads weight, head-split:  wu_h[h] == wu[h*s:(h+1)*s, :]
    wu_h = wu.reshape(heads, s, k).astype(compute_dtype)
    bu2 = bu.reshape(1, k).astype(jnp.float32)

    tq = _pick_tile(t, q_tile)
    tk = _pick_tile(t, k_tile)
    assert t % tq == 0 and t % tk == 0
    grid = (b, t // tq, t // tk)

    kernel = functools.partial(self_attention_kernel, compute_dtype=compute_dtype)

    # TODO(synk): for very small k (<128) the output lane width is sub-128
    # (masked stores); irrelevant at realistic model widths.
    return pl.pallas_call(
        kernel,
        out_shape=jax.ShapeDtypeStruct((b, t, k), x.dtype),
        grid_spec=pltpu.PrefetchScalarGridSpec(
            num_scalar_prefetch=0,
            grid=grid,
            in_specs=[
                # Q tile: block index constant across ki -> stays resident in VMEM.
                pl.BlockSpec((1, heads, tq, s), lambda bi, qi, ki: (bi, 0, qi, 0)),
                # Streamed K / V tiles.
                pl.BlockSpec((1, heads, tk, s), lambda bi, qi, ki: (bi, 0, ki, 0)),
                pl.BlockSpec((1, heads, tk, s), lambda bi, qi, ki: (bi, 0, ki, 0)),
                # Resident unifyheads weight + bias.
                pl.BlockSpec((heads, s, k), lambda bi, qi, ki: (0, 0, 0)),
                pl.BlockSpec((1, k), lambda bi, qi, ki: (0, 0)),
            ],
            out_specs=pl.BlockSpec((1, tq, k), lambda bi, qi, ki: (bi, qi, 0)),
            scratch_shapes=[
                pltpu.VMEM((heads, tq, 1), jnp.float32),   # running max
                pltpu.VMEM((heads, tq, 1), jnp.float32),   # running denom
                pltpu.VMEM((heads, tq, s), jnp.float32),   # output accumulator
            ],
        ),
        compiler_params=pltpu.CompilerParams(
            dimension_semantics=("parallel", "parallel", "arbitrary"),
            vmem_limit_bytes=vmem_limit_bytes,
        ),
    )(q_h, k_h, v_h, wu_h, bu2)


def make_params(key, k):
    ks = jax.random.split(key, 5)
    scale = 0.02
    wq = scale * jax.random.normal(ks[0], (k, k), jnp.float32)
    wk = scale * jax.random.normal(ks[1], (k, k), jnp.float32)
    wv = scale * jax.random.normal(ks[2], (k, k), jnp.float32)
    wu = scale * jax.random.normal(ks[3], (k, k), jnp.float32)
    bu = scale * jax.random.normal(ks[4], (k,), jnp.float32)
    return wq, wk, wv, wu, bu


def reference(x, params, heads):
    """Plain-JAX mirror of the PyTorch SelfAttention.forward (f32)."""
    wq, wk, wv, wu, bu = params
    b, t, k = x.shape
    s = k // heads
    q = (x @ wq).reshape(b, t, heads, s).transpose(0, 2, 1, 3)
    kk = (x @ wk).reshape(b, t, heads, s).transpose(0, 2, 1, 3)
    v = (x @ wv).reshape(b, t, heads, s).transpose(0, 2, 1, 3)
    dot = jnp.einsum("bhts,bhus->bhtu", q, kk) / math.sqrt(k)
    p = jax.nn.softmax(dot, axis=-1)
    out = jnp.einsum("bhtu,bhus->bhts", p, v).transpose(0, 2, 1, 3).reshape(b, t, k)
    return out @ wu + bu.reshape(1, 1, k)


if __name__ == "__main__":
    b, t, k, heads = 2, 8, 32, 4
    key = jax.random.PRNGKey(0)
    kx, kp = jax.random.split(key)
    x = jax.random.normal(kx, (b, t, k), jnp.float32)
    params = make_params(kp, k)

    out = self_attention(x, params, heads)
    out = jax.block_until_ready(out)

    ref = reference(x, params, heads)
    assert out.shape == (b, t, k)
    max_err = float(jnp.max(jnp.abs(out - ref)))
    # bf16 matmul inputs + f32 accumulation: tolerance chosen for bf16 precision.
    assert jnp.allclose(out, ref, atol=3e-3, rtol=3e-2), max_err
    print("KERNEL_OK")
</pallas_src>

<mosaic_0001>
module attributes {stable_mosaic.version = 11 : i64} {
  func.func @self_attention_kernel(%arg0: i32, %arg1: i32, %arg2: i32, %arg3: memref<1x4x8x8xbf16, #tpu.memory_space<vmem>>, %arg4: memref<1x4x8x8xbf16, #tpu.memory_space<vmem>>, %arg5: memref<1x4x8x8xbf16, #tpu.memory_space<vmem>>, %arg6: memref<4x8x32xbf16, #tpu.memory_space<vmem>>, %arg7: memref<1x32xf32, #tpu.memory_space<vmem>>, %arg8: memref<1x8x32xf32, #tpu.memory_space<vmem>>, %arg9: memref<4x8x1xf32, #tpu.memory_space<vmem>>, %arg10: memref<4x8x1xf32, #tpu.memory_space<vmem>>, %arg11: memref<4x8x8xf32, #tpu.memory_space<vmem>>) attributes {dimension_semantics = [#tpu.dimension_semantics<parallel>, #tpu.dimension_semantics<parallel>, #tpu.dimension_semantics<arbitrary>], iteration_bounds = array<i64: 2, 1, 1>, scalar_prefetch = 0 : i64, scratch_operands = 3 : i64, tpu.core_type = #tpu.core_type<tc>, window_params = [{transform_indices = @transform_0, window_bounds = array<i64: 1, 4, 8, 8>}, {transform_indices = @transform_1, window_bounds = array<i64: 1, 4, 8, 8>}, {transform_indices = @transform_2, window_bounds = array<i64: 1, 4, 8, 8>}, {pipeline_mode = #tpu.pipeline_mode<synchronous>, transform_indices = @transform_3, window_bounds = array<i64: 4, 8, 32>}, {pipeline_mode = #tpu.pipeline_mode<synchronous>, transform_indices = @transform_4, window_bounds = array<i64: 1, 32>}, {transform_indices = @transform_5, window_bounds = array<i64: 1, 8, 32>}]} {
    %c0_i32 = arith.constant 0 : i32
    %0 = arith.cmpi eq, %arg2, %c0_i32 : i32
    %1 = arith.extui %0 : i1 to i32
    %c0_i32_0 = arith.constant 0 : i32
    %2 = arith.cmpi ne, %1, %c0_i32_0 : i32
    scf.if %2 {
      %cst_35 = arith.constant 0xFF800000 : f32
      %36 = vector.broadcast %cst_35 : f32 to vector<4x8x1xf32>
      %c0_36 = arith.constant 0 : index
      %c0_37 = arith.constant 0 : index
      %c0_38 = arith.constant 0 : index
      %37 = vector.load %arg9[%c0_36, %c0_37, %c0_38] : memref<4x8x1xf32, #tpu.memory_space<vmem>>, vector<4x8x1xf32>
      tpu.vector_store %arg9[%c0_36, %c0_37, %c0_38], %36 {strides = array<i32>} : memref<4x8x1xf32, #tpu.memory_space<vmem>>, vector<4x8x1xf32>,
      %cst_39 = arith.constant 0.000000e+00 : f32
      %38 = vector.broadcast %cst_39 : f32 to vector<4x8x1xf32>
      %c0_40 = arith.constant 0 : index
      %c0_41 = arith.constant 0 : index
      %c0_42 = arith.constant 0 : index
      %39 = vector.load %arg10[%c0_40, %c0_41, %c0_42] : memref<4x8x1xf32, #tpu.memory_space<vmem>>, vector<4x8x1xf32>
      tpu.vector_store %arg10[%c0_40, %c0_41, %c0_42], %38 {strides = array<i32>} : memref<4x8x1xf32, #tpu.memory_space<vmem>>, vector<4x8x1xf32>,
      %cst_43 = arith.constant 0.000000e+00 : f32
      %40 = vector.broadcast %cst_43 : f32 to vector<4x8x8xf32>
      %c0_44 = arith.constant 0 : index
      %c0_45 = arith.constant 0 : index
      %c0_46 = arith.constant 0 : index
      %41 = vector.load %arg11[%c0_44, %c0_45, %c0_46] : memref<4x8x8xf32, #tpu.memory_space<vmem>>, vector<4x8x8xf32>
      tpu.vector_store %arg11[%c0_44, %c0_45, %c0_46], %40 {strides = array<i32>} : memref<4x8x8xf32, #tpu.memory_space<vmem>>, vector<4x8x8xf32>,
    } else {
    }
    %c0 = arith.constant 0 : index
    %c0_1 = arith.constant 0 : index
    %c0_2 = arith.constant 0 : index
    %c0_3 = arith.constant 0 : index
    %3 = vector.load %arg3[%c0, %c0_1, %c0_2, %c0_3] : memref<1x4x8x8xbf16, #tpu.memory_space<vmem>>, vector<1x4x8x8xbf16>
    %4 = vector.shape_cast %3 : vector<1x4x8x8xbf16> to vector<4x8x8xbf16>
    %c0_4 = arith.constant 0 : index
    %c0_5 = arith.constant 0 : index
    %c0_6 = arith.constant 0 : index
    %c0_7 = arith.constant 0 : index
    %5 = vector.load %arg4[%c0_4, %c0_5, %c0_6, %c0_7] : memref<1x4x8x8xbf16, #tpu.memory_space<vmem>>, vector<1x4x8x8xbf16>
    %6 = vector.shape_cast %5 : vector<1x4x8x8xbf16> to vector<4x8x8xbf16>
    %c0_8 = arith.constant 0 : index
    %c0_9 = arith.constant 0 : index
    %c0_10 = arith.constant 0 : index
    %c0_11 = arith.constant 0 : index
    %7 = vector.load %arg5[%c0_8, %c0_9, %c0_10, %c0_11] : memref<1x4x8x8xbf16, #tpu.memory_space<vmem>>, vector<1x4x8x8xbf16>
    %8 = vector.shape_cast %7 : vector<1x4x8x8xbf16> to vector<4x8x8xbf16>
    "tpu.trace_start"() <{level = 10 : i32, message = "hqs,hks->hqk"}> : () -> ()
    %cst = arith.constant dense<0.000000e+00> : vector<4x8x8xf32>
    %9 = tpu.matmul %4, %6, %cst {dimension_numbers = #tpu.dot_dimension_numbers<[2], [2], [1], [1], [0, 0, 0, 1, 1, 1], [0], [0]>} : vector<4x8x8xbf16>, vector<4x8x8xbf16>, vector<4x8x8xf32> -> vector<4x8x8xf32>
    "tpu.trace_stop"() : () -> ()
    %c0_12 = arith.constant 0 : index
    %c0_13 = arith.constant 0 : index
    %c0_14 = arith.constant 0 : index
    %10 = vector.load %arg9[%c0_12, %c0_13, %c0_14] : memref<4x8x1xf32, #tpu.memory_space<vmem>>, vector<4x8x1xf32>
    %cst_15 = arith.constant dense<0xFF800000> : vector<4x8xf32>
    %11 = vector.multi_reduction <maximumf>, %9, %cst_15 [2] : vector<4x8x8xf32> to vector<4x8xf32>
    %12 = vector.shape_cast %11 : vector<4x8xf32> to vector<4x8x1xf32>
    %13 = arith.maximumf %10, %12 : vector<4x8x1xf32>
    %14 = arith.subf %10, %13 : vector<4x8x1xf32>
    %15 = math.exp %14 : vector<4x8x1xf32>
    %16 = vector.broadcast %13 : vector<4x8x1xf32> to vector<4x8x8xf32>
    %17 = arith.subf %9, %16 : vector<4x8x8xf32>
    %18 = math.exp %17 : vector<4x8x8xf32>
    %c0_16 = arith.constant 0 : index
    %c0_17 = arith.constant 0 : index
    %c0_18 = arith.constant 0 : index
    %19 = vector.load %arg10[%c0_16, %c0_17, %c0_18] : memref<4x8x1xf32, #tpu.memory_space<vmem>>, vector<4x8x1xf32>
    %20 = arith.mulf %15, %19 : vector<4x8x1xf32>
    %cst_19 = arith.constant dense<0.000000e+00> : vector<4x8xf32>
    %21 = vector.multi_reduction <add>, %18, %cst_19 [2] : vector<4x8x8xf32> to vector<4x8xf32>
    %22 = vector.shape_cast %21 : vector<4x8xf32> to vector<4x8x1xf32>
    %23 = arith.addf %20, %22 : vector<4x8x1xf32>
    %c0_20 = arith.constant 0 : index
    %c0_21 = arith.constant 0 : index
    %c0_22 = arith.constant 0 : index
    %24 = vector.load %arg10[%c0_20, %c0_21, %c0_22] : memref<4x8x1xf32, #tpu.memory_space<vmem>>, vector<4x8x1xf32>
    tpu.vector_store %arg10[%c0_20, %c0_21, %c0_22], %23 {strides = array<i32>} : memref<4x8x1xf32, #tpu.memory_space<vmem>>, vector<4x8x1xf32>,
    %c0_23 = arith.constant 0 : index
    %c0_24 = arith.constant 0 : index
    %c0_25 = arith.constant 0 : index
    %25 = vector.load %arg11[%c0_23, %c0_24, %c0_25] : memref<4x8x8xf32, #tpu.memory_space<vmem>>, vector<4x8x8xf32>
    %26 = vector.broadcast %15 : vector<4x8x1xf32> to vector<4x8x8xf32>
    %27 = arith.mulf %26, %25 : vector<4x8x8xf32>
    %28 = arith.truncf %18 : vector<4x8x8xf32> to vector<4x8x8xbf16>
    "tpu.trace_start"() <{level = 10 : i32, message = "hqk,hks->hqs"}> : () -> ()
    %cst_26 = arith.constant dense<0.000000e+00> : vector<4x8x8xf32>
    %29 = tpu.matmul %28, %8, %cst_26 {dimension_numbers = #tpu.dot_dimension_numbers<[2], [1], [1], [2], [0, 0, 0, 1, 1, 2], [0], [0]>} : vector<4x8x8xbf16>, vector<4x8x8xbf16>, vector<4x8x8xf32> -> vector<4x8x8xf32>
    "tpu.trace_stop"() : () -> ()
    %30 = arith.addf %27, %29 : vector<4x8x8xf32>
    %c0_27 = arith.constant 0 : index
    %c0_28 = arith.constant 0 : index
    %c0_29 = arith.constant 0 : index
    %31 = vector.load %arg11[%c0_27, %c0_28, %c0_29] : memref<4x8x8xf32, #tpu.memory_space<vmem>>, vector<4x8x8xf32>
    tpu.vector_store %arg11[%c0_27, %c0_28, %c0_29], %30 {strides = array<i32>} : memref<4x8x8xf32, #tpu.memory_space<vmem>>, vector<4x8x8xf32>,
    %c0_30 = arith.constant 0 : index
    %c0_31 = arith.constant 0 : index
    %c0_32 = arith.constant 0 : index
    %32 = vector.load %arg9[%c0_30, %c0_31, %c0_32] : memref<4x8x1xf32, #tpu.memory_space<vmem>>, vector<4x8x1xf32>
    tpu.vector_store %arg9[%c0_30, %c0_31, %c0_32], %13 {strides = array<i32>} : memref<4x8x1xf32, #tpu.memory_space<vmem>>, vector<4x8x1xf32>,
    %c0_i32_33 = arith.constant 0 : i32
    %33 = arith.cmpi eq, %arg2, %c0_i32_33 : i32
    %34 = arith.extui %33 : i1 to i32
    %c0_i32_34 = arith.constant 0 : i32
    %35 = arith.cmpi ne, %34, %c0_i32_34 : i32
    scf.if %35 {
      %c0_35 = arith.constant 0 : index
      %c0_36 = arith.constant 0 : index
      %c0_37 = arith.constant 0 : index
      %36 = vector.load %arg11[%c0_35, %c0_36, %c0_37] : memref<4x8x8xf32, #tpu.memory_space<vmem>>, vector<4x8x8xf32>
      %c0_38 = arith.constant 0 : index
      %c0_39 = arith.constant 0 : index
      %c0_40 = arith.constant 0 : index
      %37 = vector.load %arg10[%c0_38, %c0_39, %c0_40] : memref<4x8x1xf32, #tpu.memory_space<vmem>>, vector<4x8x1xf32>
      %38 = tpu.reciprocal %37 {approx = true} : vector<4x8x1xf32> -> vector<4x8x1xf32>
      %39 = vector.broadcast %38 : vector<4x8x1xf32> to vector<4x8x8xf32>
      %40 = arith.mulf %36, %39 : vector<4x8x8xf32>
      %41 = arith.truncf %40 : vector<4x8x8xf32> to vector<4x8x8xbf16>
      %c0_41 = arith.constant 0 : index
      %c0_42 = arith.constant 0 : index
      %c0_43 = arith.constant 0 : index
      %42 = vector.load %arg6[%c0_41, %c0_42, %c0_43] : memref<4x8x32xbf16, #tpu.memory_space<vmem>>, vector<4x8x32xbf16>
      "tpu.trace_start"() <{level = 10 : i32, message = "hqs,hsk->hqk"}> : () -> ()
      %cst_44 = arith.constant dense<0.000000e+00> : vector<4x8x32xf32>
      %43 = tpu.matmul %41, %42, %cst_44 {dimension_numbers = #tpu.dot_dimension_numbers<[2], [1], [1], [2], [0, 0, 0, 1, 1, 2], [0], [0]>} : vector<4x8x8xbf16>, vector<4x8x32xbf16>, vector<4x8x32xf32> -> vector<4x8x32xf32>
      "tpu.trace_stop"() : () -> ()
      %cst_45 = arith.constant dense<0.000000e+00> : vector<8x32xf32>
      %44 = vector.multi_reduction <add>, %43, %cst_45 [0] : vector<4x8x32xf32> to vector<8x32xf32>
      %c0_46 = arith.constant 0 : index
      %c0_47 = arith.constant 0 : index
      %45 = vector.load %arg7[%c0_46, %c0_47] : memref<1x32xf32, #tpu.memory_space<vmem>>, vector<1x32xf32>
      %46 = vector.broadcast %45 : vector<1x32xf32> to vector<8x32xf32>
      %47 = arith.addf %44, %46 : vector<8x32xf32>
      %c0_48 = arith.constant 0 : index
      %c0_49 = arith.constant 0 : index
      %c0_50 = arith.constant 0 : index
      %48 = vector.load %arg8[%c0_48, %c0_49, %c0_50] : memref<1x8x32xf32, #tpu.memory_space<vmem>>, vector<1x8x32xf32>
      %49 = vector.shape_cast %48 : vector<1x8x32xf32> to vector<8x32xf32>
      %50 = vector.shape_cast %47 : vector<8x32xf32> to vector<1x8x32xf32>
      tpu.vector_store %arg8[%c0_48, %c0_49, %c0_50], %50 {strides = array<i32>} : memref<1x8x32xf32, #tpu.memory_space<vmem>>, vector<1x8x32xf32>,
    } else {
    }
    return
  }
  func.func @transform_0(%arg0: i32, %arg1: i32, %arg2: i32) -> (i32, i32, i32, i32) {
    %c0_i32 = arith.constant 0 : i32
    %c0_i32_0 = arith.constant 0 : i32
    %c0_i32_1 = arith.constant 0 : i32
    return %arg0, %c0_i32, %arg1, %c0_i32_0 : i32, i32, i32, i32
  }
  func.func @transform_1(%arg0: i32, %arg1: i32, %arg2: i32) -> (i32, i32, i32, i32) {
    %c0_i32 = arith.constant 0 : i32
    %c0_i32_0 = arith.constant 0 : i32
    %c0_i32_1 = arith.constant 0 : i32
    return %arg0, %c0_i32, %arg2, %c0_i32_0 : i32, i32, i32, i32
  }
  func.func @transform_2(%arg0: i32, %arg1: i32, %arg2: i32) -> (i32, i32, i32, i32) {
    %c0_i32 = arith.constant 0 : i32
    %c0_i32_0 = arith.constant 0 : i32
    %c0_i32_1 = arith.constant 0 : i32
    return %arg0, %c0_i32, %arg2, %c0_i32_0 : i32, i32, i32, i32
  }
  func.func @transform_3(%arg0: i32, %arg1: i32, %arg2: i32) -> (i32, i32, i32) {
    %c0_i32 = arith.constant 0 : i32
    %c0_i32_0 = arith.constant 0 : i32
    %c0_i32_1 = arith.constant 0 : i32
    %c0_i32_2 = arith.constant 0 : i32
    return %c0_i32, %c0_i32_0, %c0_i32_1 : i32, i32, i32
  }
  func.func @transform_4(%arg0: i32, %arg1: i32, %arg2: i32) -> (i32, i32) {
    %c0_i32 = arith.constant 0 : i32
    %c0_i32_0 = arith.constant 0 : i32
    %c0_i32_1 = arith.constant 0 : i32
    return %c0_i32, %c0_i32_0 : i32, i32
  }
  func.func @transform_5(%arg0: i32, %arg1: i32, %arg2: i32) -> (i32, i32, i32) {
    %c0_i32 = arith.constant 0 : i32
    %c0_i32_0 = arith.constant 0 : i32
    return %arg0, %arg1, %c0_i32 : i32, i32, i32
  }
}

</mosaic_0001>

<bundles_post_ra>
// kernel: tpu_custom_call.1
= control target key start
LH: loop header
LB: loop body
LE: loop exit
PB: predicated region body
PF: predicated region fallthrough
CT: control target
= control target key end

     0   :  { %s1711_s0 = inlined_call_operand.hbm [shape: bf16[2,4,8,8], index: 0, kind: input, shape index: {}]   ;;  %s1712_s1 = inlined_call_operand.hbm [shape: bf16[2,4,8,8], index: 1, kind: input, shape index: {}]   ;;  %s1713_s2 = inlined_call_operand.hbm [shape: bf16[2,4,8,8], index: 2, kind: input, shape index: {}]   ;;  %s1714_s3 = inlined_call_operand.hbm [shape: bf16[4,8,32], index: 3, kind: input, shape index: {}]   ;;  %s1715_s4 = inlined_call_operand.vmem [shape: f32[1,32], index: 4, kind: input, shape index: {}]   ;;  %s1716_s5 = inlined_call_operand.hbm [shape: f32[2,8,32], index: 5, kind: output, shape index: {}]  }
   0x1   :  { %1724 = sst [smem:[#allocation21_spill]] %s1711_s0 }
   0x2   :  { %1725 = sst [smem:[#allocation22_spill]] %s1712_s1 }
   0x3   :  { %1726 = sst [smem:[#allocation23_spill]] %s1714_s3 }
   0x4   :  { %10 = vsyncpa [#allocation6], 0 }
   0x5   :  { %12 = vsyncpa [#allocation6 + $0x1], 0 }
   0x6   :  { %13 = vsyncpa [#allocation9], 0 }
   0x7   :  { %15 = vsyncpa [#allocation9 + $0x1], 0 }
   0x8   :  { %16 = vsyncpa [#allocation12], 0 }
   0x9   :  { %17 = vsyncpa [#allocation7], 0 }
   0xa   :  { %19 = vsyncpa [#allocation7 + $0x1], 0  ;;  %s1393_s18 = smov 0   ;;  %s1395_s19 = smov 0  }
   0xb   :  { %s1397_s20 = smov 0   ;;  %s1399_s21 = smov 0  }
   0xc   :  { %s1401_s22 = smov 0   ;;  %s1403_s23 = smov 0  }
   0xd LB: > { %1727 = sst [smem:[#allocation18_spill]] %s1351_s22  ;;  %s44_s24 = sadd.s32 1, %s1351_s22  ;;  %s1355_s23 = sphi %s1403_s23, %s25_s23   ;;  %s1351_s22 = sphi %s1401_s22, %s1743_s22   ;;  %s1347_s21 = sphi %s1399_s21, %s1742_s21   ;;  %s1343_s20 = sphi %s1397_s20, %s1746_s20   ;;  %s1339_s19 = sphi %s1395_s19, %s1745_s19   ;;  %s1335_s18 = sphi %s1393_s18, %s1744_s18  }
   0xe   : > { %s53_s25 = sadd.s32 1, %s1343_s20  ;;  %p46_p0 = scmp.ge.s32.totalorder %s44_s24, 2 }
   0xf   : > { %p60_p1 = scmp.ne.s32.totalorder %s1343_s20, %s1339_s19  ;;  %p61_p2 = scmp.eq.s32.totalorder %s1355_s23, 0 }
  0x10   : > { %s1748_s24 = smov (%p46_p0, %s44_s24), 0  ;;  %p994_p4 = scmp.ge.s32.totalorder %s1355_s23, 2 }
  0x11   : > { %1728 = sst [smem:[#allocation19_spill]] %s1748_s24  ;;  %p62_p3 = por %p61_p2, %p60_p1 }
  0x12   : > { %s48_s26 = ssub.s32 %s1351_s22, %s1748_s24  ;;  %p1060_p6 = scmp.lt.s32.totalorder %s1355_s23, 2 }
  0x13   : > { %p51_p5 = scmp.eq.s32.totalorder %s48_s26, 0  ;;  %s1717_s27 = sand.u32 1, %s1343_s20  }
  0x14   : > { %s1439_s28 = sshll.u32 %s1351_s22, 4  ;;  %s1446_s30 = sshll.u32 %s1717_s27, 4 }
  0x15   : > { %s1442_s29 = scalar_select %p51_p5, %s1343_s20, %s53_s25  }
  0x16   : > { %p1448_p7 = pnand %p1060_p6, %p62_p3  ;;  %s256_s7 = sand.u32 1, %s1355_s23  }
  0x17   : > { %1729 = sst [smem:[#allocation20_spill]] %s1442_s29  ;;  %s260_s11 = scalar_lea.vmem [#allocation8], %s1446_s30 }
  0x18   : > { %s1731_s1 = sld [smem:[#allocation22_spill]]  ;;  %s269_s12 = sshll.u32 %s260_s11, 4  ;;  %s270_s12 = int_to_ptr.vmem [resolvable:$true] %s269_s12 }
  0x19   : > { %s1458_s14 = scalar_lea.sflag [#allocation9], %s256_s7  ;;  %s1718_s15 = smov 64  }
  0x1a   : > { %s1720_s16 = smov 4   ;;  %s1467_s17 = sadd.s32 4294967295, %s1355_s23  }
  0x1b   : > { %s991_s25 = sadd.s32 4294967294, %s1355_s23   ;;  %p66_p8 = scmp.ne.s32.totalorder %s1339_s19, %s1335_s18 }
  0x1c   : > { %p67_p9 = scmp.eq.s32.totalorder %s1467_s17, 0  ;;  %p190_p10 = scmp.eq.s32.totalorder %s1467_s17, 1 }
  0x1d   : > { %p196_p11 = scmp.eq.s32.totalorder %s991_s25, 1  ;;  %p992_p12 = scmp.ge.s32.totalorder %s1355_s23, 1 }
  0x1e   : > { %s266_s10 = scalar_lea.hbm %s1731_s1, %s1439_s28  ;;  %p1477_p13 = por %p67_p9, %p66_p8 }
  0x1f   : > { %s267_s13 = sshll.u32 %s266_s10, 4  ;;  %p1484_p0 = por %p190_p10, %p60_p1  ;;  %s268_s13 = int_to_ptr.hbm [resolvable:$true] %s267_s13 }
  0x20   : > { %1051 = dma.hbm_to_vmem [thread:$0]  (!%p1448_p7), %s268_s13, 256, %s270_s12, %s1458_s14, %s1718_s15, %s1718_s15, %s1720_s16  }
  0x21   : > { %p1488_p2 = por %p196_p11, %p66_p8  ;;  %p203_p3 = scmp.lt.s32.totalorder %s1355_s23, 3 }
  0x22   : > { %s1735_s3 = sld [smem:[#allocation23_spill]]  ;;  %s1359_s13 = smov [#allocation11]  }
  0x23   : > { %p1496_p5 = pnand %p992_p12, %p203_p3  ;;  %s216_s25 = sshll.u32 %s1359_s13, 4  ;;  %s217_s25 = int_to_ptr.vmem [resolvable:$true] %s216_s25 }
  0x24   : > { %s1737_s0 = sld [smem:[#allocation21_spill]]  ;;  %s237_s16 = scalar_lea.vmem [#allocation5], %s1446_s30 }
  0x25   : > { %p1041_p1 = pneg %p1496_p5  ;;  %s246_s1 = sshll.u32 %s237_s16, 4  ;;  %s247_s1 = int_to_ptr.vmem [resolvable:$true] %s246_s1 }
  0x26   : > { %s1739_s24 = smov 64   ;;  %s1740_s22 = sand.u32 1, %s1343_s20  }
  0x27   : > { %p1042_p6 = pnand %p1041_p1, %p67_p9  ;;  %s234_s13 = scalar_lea.sflag [#allocation6], %s1740_s22 }
  0x28   : > { %s214_s11 = sshll.u32 %s1735_s3, 4  ;;  %s1738_s3 = smov 4   ;;  %s215_s11 = int_to_ptr.hbm [resolvable:$true] %s214_s11 }
  0x29   : > { %1044 = dma.hbm_to_vmem [thread:$0]  (!%p1042_p6), %s215_s11, 256, %s217_s25, [#allocation12], %s1739_s24, %s1739_s24, %s1738_s3  }
  0x2a   : > { %s243_s10 = scalar_lea.hbm %s1737_s0, %s1439_s28  ;;  %s289_s0 = scalar_lea.hbm %s1713_s2, %s1439_s28 }
  0x2b   : > { %s244_s15 = sshll.u32 %s243_s10, 4  ;;  %s283_s10 = scalar_lea.vmem [#allocation10], %s1446_s30  ;;  %s245_s15 = int_to_ptr.hbm [resolvable:$true] %s244_s15 }
  0x2c   : > { %1048 = dma.hbm_to_vmem [thread:$0]  (!%p1448_p7), %s245_s15, 256, %s247_s1, %s234_s13, %s1739_s24, %s1739_s24, %s1738_s3  }
  0x2d   : > { %s292_s29 = sshll.u32 %s283_s10, 4  ;;  %s290_s16 = sshll.u32 %s289_s0, 4  ;;  %s293_s29 = int_to_ptr.vmem [resolvable:$true] %s292_s29  ;;  %s291_s16 = int_to_ptr.hbm [resolvable:$true] %s290_s16 }
  0x2e   : > { %1054 = dma.hbm_to_vmem [thread:$0]  (!%p1448_p7), %s291_s16, 256, %s293_s29, %s1458_s14, %s1739_s24, %s1739_s24, %s1738_s3  }
  0x2f   : > { %304 = sbr.rel (%p1496_p5) target bundleno = 830 (0x33e), region = 40  ;;  %s1533_s1 = sand.u32 (!%p1496_p5), 1, %s1339_s19  }
  0x30   : > { %s1005_s22 = sshll.u32 (!%p1496_p5), %s1533_s1, 4  ;;  %s307_s28 = scalar_lea.sflag (!%p1496_p5), [#allocation6], %s1533_s1 }
  0x31   : > { %s310_s30 = scalar_lea.vmem (!%p1496_p5), [#allocation5], %s1005_s22 }
  0x34   : > { %1318 = dma.done.wait (%p1477_p13), %s307_s28, 256  }
  0x35   : > { %1320 = vsyncadd (%p1477_p13), %s307_s28, 4294967040  ;;  %s316_s0 = sand.u32 1, %s1467_s17   ;;  %s320_s24 = scalar_lea.vmem [#allocation8], %s1005_s22 }
  0x36   : > { %s317_s3 = scalar_lea.sflag [#allocation9], %s316_s0 }
  0x37   : > { %1322 = dma.done.wait (%p1477_p13), %s317_s3, 512  }
  0x38   : > { %1324 = vsyncadd (%p1477_p13), %s317_s3, 4294966784  ;;  %s1546_s29 = scalar_lea.vmem [#allocation10], %s1005_s22 }
  0x39   : > { %1326 = dma.done.wait (%p67_p9), [#allocation12], 256  }
  0x3a   : > { %1328 = vsyncadd (%p67_p9), [#allocation12], 4294967040  ;;  %vm387_vm0 = vcmask 64512   ;;  %v396_v0 = vld [vmem:[%s320_s24] sm:$0xf]  ;;  %vm378_vm1 = vcmask 7168  }
  0x3b   : > { %v398_v1 = vld [vmem:[%s320_s24 + $0x8] sm:$0xf]  ;;  %v409_v2 = vsel %vm387_vm0, %v396_v0, 0  ;;  %v397_v4 = vld [vmem:[%s320_s24 + $0x4] sm:$0xf]  ;;  %v1360_v12 = vmov -inf  }
  0x3c   : > { %v447_v3 = vsel %vm387_vm0, %v398_v1, 0  ;;  %418 = vmatpush.bf16.xpose.msra.mxu0 %v409_v2  ;;  %v428_v5 = vsel %vm387_vm0, %v397_v4, 0  ;;  %v399_v6 = vld [vmem:[%s320_s24 + $0xc] sm:$0xf]  ;;  %v392_v8 = vld [vmem:[%s310_s30] sm:$0xf] }
  0x3d   : > { %456 = vmatpush.bf16.xpose.msra.mxu2 %v447_v3  ;;  %437 = vmatpush.bf16.xpose.msra.mxu1 %v428_v5  ;;  %v466_v7 = vsel %vm387_vm0, %v399_v6, 0  ;;  %v394_v9 = vld [vmem:[%s310_s30 + $0x8] sm:$0xf]  ;;  %v393_v10 = vld [vmem:[%s310_s30 + $0x4] sm:$0xf]  ;;  %379 = vst.msk [vmem:[#allocation2] sm:$0xff] %vm378_vm1, %v1360_v12 }
  0x3e   : > { %475 = vmatpush.bf16.xpose.msra.mxu3 %v466_v7  ;;  %v395_v11 = vld [vmem:[%s310_s30 + $0xc] sm:$0xf]  ;;  %380 = vst.msk [vmem:[#allocation2 + $0x8] sm:$0xff] %vm378_vm1, %v1360_v12  ;;  %v1361_v25 = vmov 0   ;;  %v1362_v26 = vmov 0.0   ;;  %vm609_vm2 = vcmask 1043456  }
  0x3f   : > { %381 = vst.msk [vmem:[#allocation2 + $0x10] sm:$0xff] %vm378_vm1, %v1360_v12  ;;  %1118 = vset.pattern.permute.xlu0 %v1361_v25  ;;  %1117 = vset.pattern.permute.xlu2 %v1361_v25  ;;  %v402_v43 = vld [vmem:[%s1546_s29 + $0x8] sm:$0xf]  ;;  %v403_v45 = vld [vmem:[%s1546_s29 + $0xc] sm:$0xf]  ;;  %s1009_s6 = sshll.u32 %s1533_s1, 3 }
  0x40   : > { %382 = vst.msk [vmem:[#allocation2 + $0x18] sm:$0xff] %vm378_vm1, %v1360_v12  ;;  %1119 = vset.pattern.permute.xlu1 %v1361_v25  ;;  %v649_v44 = vsel %vm609_vm2, %v402_v43, 0  ;;  %v668_v46 = vsel %vm609_vm2, %v403_v45, 0  ;;  %v400_v47 = vld [vmem:[%s1546_s29] sm:$0xf]  ;;  %s1023_s14 = sshll.u32 %s1347_s21, 3 }
  0x41   : > { %385 = vst.msk [vmem:[#allocation3 + $0x10] sm:$0xff] %vm378_vm1, %v1362_v26  ;;  %v611_v48 = vsel %vm609_vm2, %v400_v47, 0  ;;  %v401_v50 = vld [vmem:[%s1546_s29 + $0x4] sm:$0xf]  ;;  %vm818_vm3 = vcmask 261120   ;;  %s844_s26 = scalar_lea.hbm %s1716_s5, %s1023_s14  ;;  %s372_s21 = scalar_lea.vmem [#allocation13], %s1009_s6 }
  0x42   : > { %383 = vst.msk [vmem:[#allocation3] sm:$0xff] %vm378_vm1, %v1362_v26  ;;  %v630_v52 = vsel %vm609_vm2, %v401_v50, 0  ;;  %s846_s25 = sshll.u32 %s372_s21, 4  ;;  %s848_s13 = sshll.u32 %s844_s26, 4  ;;  %s847_s25 = int_to_ptr.vmem [resolvable:$true] %s846_s25  ;;  %s849_s13 = int_to_ptr.hbm [resolvable:$true] %s848_s13 }
  0x43   : > { %1010 = vmatmul.msk.bf16.vlgmr.msra.gmra.mxu0 %vm387_vm0, %v392_v8  ;;  %384 = vst.msk [vmem:[#allocation3 + $0x8] sm:$0xff] %vm378_vm1, %v1362_v26  ;;  %s833_s27 = scalar_lea.sflag [#allocation7], %s1533_s1  ;;  %s1279_s9 = sshra.s32 %s849_s13, 4  ;;  %s1280_s9 = int_to_ptr.hbm [resolvable:$true] %s1279_s9 }
  0x44   : > { %1012 = vmatmul.msk.bf16.vlgmr.msra.gmra.mxu2 %vm387_vm0, %v394_v9  ;;  %1011 = vmatmul.msk.bf16.vlgmr.msra.gmra.mxu1 %vm387_vm0, %v393_v10  ;;  %386 = vst.msk [vmem:[#allocation3 + $0x18] sm:$0xff] %vm378_vm1, %v1362_v26  ;;  %v1588_v27 = vld [vmem:[#allocation2] sm:$0xff]  ;;  %s1281_s10 = scalar_lea.hbm %s1280_s9, 8  ;;  %s1285_s28 = scalar_lea.hbm %s1716_s5, 16 }
  0x45   : > { %1013 = vmatmul.msk.bf16.vlgmr.msra.gmra.mxu3 %vm387_vm0, %v395_v11  ;;  %388 = vst.msk [vmem:[#allocation4] sm:$0xff] %vm387_vm0, %v1362_v26  ;;  %v1600_v33 = vld [vmem:[#allocation2 + $0x8] sm:$0xff]  ;;  %658 = vmatpush.bf16.msrb.mxu2 %v649_v44  ;;  %p1282_p7 = scmp.ne.s32.totalorder %s1280_s9, %s1281_s10  ;;  %p1286_p10 = scmp.lt.s32.totalorder %s1280_s9, %s1716_s5 }
  0x46   : > { %389 = vst.msk [vmem:[#allocation4 + $0x8] sm:$0xff] %vm387_vm0, %v1362_v26  ;;  %v1598_v31 = vld [vmem:[#allocation2 + $0x10] sm:$0xff]  ;;  %677 = vmatpush.bf16.msrb.mxu3 %v668_v46  ;;  %620 = vmatpush.bf16.msrb.mxu0 %v611_v48  ;;  %p1287_p11 = scmp.lt.s32.totalorder %s1285_s28, %s1281_s10 }
  0x47   : > { %390 = vst.msk [vmem:[#allocation4 + $0x10] sm:$0xff] %vm387_vm0, %v1362_v26  ;;  %v484_v39 = vld [vmem:[#allocation2 + $0x18] sm:$0xff]  ;;  %639 = vmatpush.bf16.msrb.mxu1 %v630_v52  ;;  %p1283_p8 = pnand %p1282_p7, %p1484_p0 }
  0x48   : > { %391 = vst.msk [vmem:[#allocation4 + $0x18] sm:$0xff] %vm387_vm0, %v1362_v26  ;;  %p1288_p12 = por %p1287_p11, %p1286_p10 }
  0x49   : > { %p1284_p9 = pneg %p1283_p8 }
  0x4b   : > { %p1289_p13 = pnand %p1288_p12, %p1284_p9 }
  0x4e   : > { %v576_v46 = vld [vmem:[#allocation4 + $0x10] sm:$0xff] }
  0x4f   : > { %v577_v44 = vld [vmem:[#allocation4 + $0x18] sm:$0xff] }
  0xc0   : > { %v1564_v13 = vpop.f32.mrf.mxu0 }
  0xc1   : > { %v485_v14 = vsel %vm387_vm0, %v1564_v13, -inf  ;;  %v1568_v15 = vpop.f32.mrf.mxu1 }
  0xc2   : > { %486 = vmax.xlane.f32.xlu1 %v485_v14  ;;  %v488_v18 = vsel %vm387_vm0, %v1568_v15, -inf }
  0xc7   : > { %v1570_v16 = vpop.f32.mrf.mxu2 }
  0xc8   : > { %v491_v17 = vsel %vm387_vm0, %v1570_v16, -inf  ;;  %v422_v19 = vpop.f32.mrf.mxu0  ;;  %v1576_v20 = vpop.f32.mrf.mxu3 }
  0xc9   : > { %492 = vmax.xlane.f32.xlu0 %v491_v17  ;;  %v441_v21 = vpop.f32.mrf.mxu1  ;;  %v494_v22 = vsel %vm387_vm0, %v1576_v20, -inf  ;;  %v547_v19 = vld [vmem:[#allocation3 + $0x10] sm:$0xff] }
  0xca   : > { %489 = vmax.xlane.f32.xlu1 %v488_v18 }
  0xcf   : > { %v460_v23 = vpop.f32.mrf.mxu2 }
  0xd0   : > { %v479_v24 = vpop.f32.mrf.mxu3  ;;  %v548_v23 = vld [vmem:[#allocation3 + $0x18] sm:$0xff] }
  0xd1   : > { %495 = vmax.xlane.f32.xlu0 %v494_v22 }
 0x135   : > { %v487_v28 = vpop.xlane.xlu1 %486 }
 0x136   : > { %v1591_v29 = vmax.f32 %v1588_v27, %v487_v28  ;;  %v545_v28 = vld [vmem:[#allocation3] sm:$0xff] }
 0x138   : > { %v501_v30 = vsub.f32 %v1588_v27, %v1591_v29  ;;  %691 = vst.msk [vmem:[#allocation2] sm:$0xff] %vm378_vm1, %v1591_v29  ;;  %515 = vperm.xlu0 %1118, %v1591_v29  }
 0x13a   : > { %v505_v14 = vmul.f32 1.442695, %v501_v30 }
 0x13c   : > { %v493_v32 = vpop.xlane.xlu0 %492 }
 0x13d   : > { %v1603_v34 = vmax.f32 %v1598_v31, %v493_v32  ;;  %v490_v35 = vpop.xlane.xlu1 %489 }
 0x13e   : > { %v1610_v37 = vmax.f32 %v1600_v33, %v490_v35  ;;  %v546_v35 = vld [vmem:[#allocation3 + $0x8] sm:$0xff] }
 0x13f   : > { %v503_v36 = vsub.f32 %v1598_v31, %v1603_v34  ;;  %693 = vst.msk [vmem:[#allocation2 + $0x10] sm:$0xff] %vm378_vm1, %v1603_v34  ;;  %525 = vperm.xlu2 %1117, %v1603_v34  }
 0x140   : > { %v502_v38 = vsub.f32 %v1600_v33, %v1610_v37  ;;  %692 = vst.msk [vmem:[#allocation2 + $0x8] sm:$0xff] %vm378_vm1, %v1610_v37  ;;  %520 = vperm.xlu1 %1119, %v1610_v37  }
 0x144   : > { %v496_v40 = vpop.xlane.xlu0 %495 }
 0x145   : > { %v500_v41 = vmax.f32 %v484_v39, %v496_v40 }
 0x147   : > { %v504_v42 = vsub.f32 %v484_v39, %v500_v41  ;;  %694 = vst.msk [vmem:[#allocation2 + $0x18] sm:$0xff] %vm378_vm1, %v500_v41  ;;  %530 = vperm.xlu2 %1117, %v500_v41  }
 0x149   : > { %v511_v8 = vmul.f32 1.442695, %v504_v42 }
 0x199   : > { %v526_v49 = vpop.permute.xlu2 %525 }
 0x19a   : > { %v535_v51 = vsub.f32 %v1570_v16, %v526_v49  ;;  %v507_v16 = vmul.f32 1.442695, %v502_v38 }
 0x19c   : > { %v541_v53 = vmul.f32 1.442695, %v535_v51 }
 0x19e   : > { %1121 = vpow2.f32 %v541_v53 }
 0x1a1   : > { %v531_v54 = vpop.permute.xlu2 %530 }
 0x1a2   : > { %v536_v55 = vsub.f32 %v1576_v20, %v531_v54 }
 0x1a4   : > { %v1122_v56 = vpop.eup %1121  ;;  %v543_v57 = vmul.f32 1.442695, %v536_v55 }
 0x1a5   : > { %v559_v58 = vsel %vm387_vm0, %v1122_v56, 0.0  ;;  %v604_v59 = vpack.c.bf16 %v1122_v56, %v1122_v56 }
 0x1a6   : > { %1123 = vpow2.f32 %v543_v57  ;;  %560 = vadd.xlane.f32.xlu2 %v559_v58  ;;  %v574_v57 = vld [vmem:[#allocation4] sm:$0xff] }
 0x1a7   : > { %1016 = vmatmul.msk.bf16.vlgmr.msrb.gmra.mxu2 %vm387_vm0, %v604_v59 }
 0x1aa   : > { %v516_v60 = vpop.permute.xlu0 %515 }
 0x1ab   : > { %v533_v62 = vsub.f32 %v1564_v13, %v516_v60  ;;  %v509_v13 = vmul.f32 1.442695, %v503_v36 }
 0x1ac   : > { %v1124_v61 = vpop.eup %1123 }
 0x1ad   : > { %v562_v63 = vsel %vm387_vm0, %v1124_v61, 0.0  ;;  %v605_v0 = vpack.c.bf16 %v1124_v61, %v1124_v61  ;;  %v537_v1 = vmul.f32 1.442695, %v533_v62 }
 0x1ae   : > { %563 = vadd.xlane.f32.xlu1 %v562_v63  ;;  %v575_v63 = vld [vmem:[#allocation4 + $0x8] sm:$0xff] }
 0x1af   : > { %1017 = vmatmul.msk.bf16.vlgmr.msrb.gmra.mxu3 %vm387_vm0, %v605_v0  ;;  %1125 = vpow2.f32 %v537_v1 }
 0x1b2   : > { %v521_v2 = vpop.permute.xlu1 %520 }
 0x1b3   : > { %v534_v3 = vsub.f32 %v1568_v15, %v521_v2 }
 0x1b5   : > { %v1126_v4 = vpop.eup %1125  ;;  %v539_v5 = vmul.f32 1.442695, %v534_v3  ;;  %v741_v3 = vld [vmem:[#allocation11 + $0xc] sm:$0xf] }
 0x1b6   : > { %v553_v6 = vsel %vm387_vm0, %v1126_v4, 0.0  ;;  %v602_v7 = vpack.c.bf16 %v1126_v4, %v1126_v4  ;;  %v803_v4 = vsel %vm609_vm2, %v741_v3, 0 }
 0x1b7   : > { %1127 = vpow2.f32 %v539_v5  ;;  %554 = vadd.xlane.f32.xlu0 %v553_v6  ;;  %812 = vmatpush.bf16.msra.mxu3 %v803_v4  ;;  %v740_v5 = vld [vmem:[#allocation11 + $0x8] sm:$0xf] }
 0x1b8   : > { %1014 = vmatmul.msk.bf16.vlgmr.msrb.gmra.mxu0 %vm387_vm0, %v602_v7  ;;  %1129 = vpow2.f32 %v511_v8  ;;  %v784_v6 = vsel %vm609_vm2, %v740_v5, 0  ;;  %v739_v7 = vld [vmem:[#allocation11 + $0x4] sm:$0xf] }
 0x1b9   : > { %1131 = vpow2.f32 %v509_v13  ;;  %793 = vmatpush.bf16.msra.mxu2 %v784_v6  ;;  %v765_v8 = vsel %vm609_vm2, %v739_v7, 0 }
 0x1ba   : > { %1133 = vpow2.f32 %v505_v14  ;;  %774 = vmatpush.bf16.msra.mxu1 %v765_v8 }
 0x1bb   : > { %1135 = vpow2.f32 %v507_v16 }
 0x1bd   : > { %v1128_v9 = vpop.eup %1127 }
 0x1be   : > { %v556_v10 = vsel %vm387_vm0, %v1128_v9, 0.0  ;;  %v603_v11 = vpack.c.bf16 %v1128_v9, %v1128_v9  ;;  %v1130_v12 = vpop.eup %1129  ;;  %v738_v9 = vld [vmem:[#allocation11] sm:$0xf] }
 0x1bf   : > { %557 = vadd.xlane.f32.xlu2 %v556_v10  ;;  %v1132_v15 = vpop.eup %1131  ;;  %v552_v24 = vmul.f32 %v1130_v12, %v548_v23  ;;  %v746_v10 = vsel %vm609_vm2, %v738_v9, 0 }
 0x1c0   : > { %1015 = vmatmul.msk.bf16.vlgmr.msrb.gmra.mxu1 %vm387_vm0, %v603_v11  ;;  %v1134_v17 = vpop.eup %1133  ;;  %v551_v20 = vmul.f32 %v1132_v15, %v547_v19  ;;  %755 = vmatpush.bf16.msra.mxu0 %v746_v10 }
 0x1c1   : > { %v1136_v18 = vpop.eup %1135  ;;  %v549_v31 = vmul.f32 %v1134_v17, %v545_v28 }
 0x1c2   : > { %v550_v39 = vmul.f32 %v1136_v18, %v546_v35 }
 0x1c7   : > { %595 = vperm.xlu1 %1119, %v1130_v12  }
 0x1d7   : > { %590 = vperm.xlu2 %1117, %v1132_v15  }
 0x1df   : > { %580 = vperm.xlu2 %1117, %v1134_v17  }
 0x1e7   : > { %585 = vperm.xlu2 %1117, %v1136_v18  }
 0x219   : > { %v561_v21 = vpop.xlane.xlu2 %560 }
 0x21a   : > { %v567_v22 = vadd.f32 %v561_v21, %v551_v20 }
 0x21c   : > { %572 = vst.msk [vmem:[#allocation3 + $0x10] sm:$0xff] %vm378_vm1, %v567_v22 }
 0x221   : > { %v564_v25 = vpop.xlane.xlu1 %563 }
 0x222   : > { %v568_v26 = vadd.f32 %v564_v25, %v552_v24 }
 0x223   : > { %v704_v27 = vld [vmem:[#allocation3 + $0x10] sm:$0xff] }
 0x224   : > { %573 = vst.msk [vmem:[#allocation3 + $0x18] sm:$0xff] %vm378_vm1, %v568_v26  ;;  %1137 = vrcp.f32 %v704_v27 }
 0x22a   : > { %v1138_v29 = vpop.eup %1137  ;;  %v660_v30 = vpop.f32.mrf.mxu2 }
 0x22b   : > { %722 = vperm.xlu0 %1118, %v1138_v29   ;;  %v555_v32 = vpop.xlane.xlu0 %554  ;;  %v705_v33 = vld [vmem:[#allocation3 + $0x18] sm:$0xff] }
 0x22c   : > { %v565_v34 = vadd.f32 %v555_v32, %v549_v31  ;;  %1139 = vrcp.f32 %v705_v33 }
 0x22e   : > { %570 = vst.msk [vmem:[#allocation3] sm:$0xff] %vm378_vm1, %v565_v34 }
 0x232   : > { %v1140_v36 = vpop.eup %1139  ;;  %v662_v37 = vpop.f32.mrf.mxu2 }
 0x233   : > { %v679_v38 = vpop.f32.mrf.mxu3  ;;  %v558_v40 = vpop.xlane.xlu2 %557  ;;  %727 = vperm.xlu2 %1117, %v1140_v36  }
 0x234   : > { %v566_v41 = vadd.f32 %v558_v40, %v550_v39  ;;  %v1120_v39 = vld [vmem:[%s1715_s4] ss:$0 sm:$0xff] }
 0x235   : > { %v702_v42 = vld [vmem:[#allocation3] sm:$0xff]  ;;  %v622_v43 = vpop.f32.mrf.mxu0 }
 0x236   : > { %571 = vst.msk [vmem:[#allocation3 + $0x8] sm:$0xff] %vm378_vm1, %v566_v41  ;;  %1141 = vrcp.f32 %v702_v42 }
 0x239   : > { %v596_v45 = vpop.permute.xlu1 %595 }
 0x23a   : > { %v601_v47 = vmul.f32 %v596_v45, %v577_v44 }
 0x23b   : > { %v681_v48 = vpop.f32.mrf.mxu3  ;;  %v591_v49 = vpop.permute.xlu2 %590 }
 0x23c   : > { %v1142_v50 = vpop.eup %1141  ;;  %v686_v51 = vadd.f32 %v679_v38, %v601_v47  ;;  %v600_v52 = vmul.f32 %v591_v49, %v576_v46 }
 0x23d   : > { %712 = vperm.xlu1 %1119, %v1142_v50   ;;  %v703_v53 = vld [vmem:[#allocation3 + $0x8] sm:$0xff]  ;;  %v624_v55 = vpop.f32.mrf.mxu0  ;;  %v641_v56 = vpop.f32.mrf.mxu1 }
 0x23e   : > { %690 = vst.msk [vmem:[#allocation4 + $0x18] sm:$0xff] %vm387_vm0, %v686_v51  ;;  %v685_v54 = vadd.f32 %v660_v30, %v600_v52  ;;  %1143 = vrcp.f32 %v703_v53 }
 0x240   : > { %689 = vst.msk [vmem:[#allocation4 + $0x10] sm:$0xff] %vm387_vm0, %v685_v54 }
 0x243   : > { %v581_v58 = vpop.permute.xlu2 %580 }
 0x244   : > { %v1144_v59 = vpop.eup %1143  ;;  %v598_v60 = vmul.f32 %v581_v58, %v574_v57 }
 0x245   : > { %717 = vperm.xlu2 %1117, %v1144_v59   ;;  %v643_v62 = vpop.f32.mrf.mxu1  ;;  %v701_v11 = vld [vmem:[#allocation4 + $0x18] sm:$0xff] }
 0x246   : > { %v683_v61 = vadd.f32 %v622_v43, %v598_v60 }
 0x247   : > { %v700_v15 = vld [vmem:[#allocation4 + $0x10] sm:$0xff] }
 0x248   : > { %687 = vst.msk [vmem:[#allocation4] sm:$0xff] %vm387_vm0, %v683_v61 }
 0x24b   : > { %v586_v0 = vpop.permute.xlu2 %585 }
 0x24c   : > { %v599_v1 = vmul.f32 %v586_v0, %v575_v63 }
 0x24e   : > { %v684_v2 = vadd.f32 %v641_v56, %v599_v1 }
 0x24f   : > { %v698_v23 = vld [vmem:[#allocation4] sm:$0xff] }
 0x250   : > { %688 = vst.msk [vmem:[#allocation4 + $0x8] sm:$0xff] %vm387_vm0, %v684_v2 }
 0x257   : > { %v699_v18 = vld [vmem:[#allocation4 + $0x8] sm:$0xff] }
 0x28d   : > { %v728_v12 = vpop.permute.xlu2 %727 }
 0x28e   : > { %v733_v13 = vmul.f32 %v728_v12, %v701_v11 }
 0x290   : > { %v737_v14 = vpack.c.bf16 %v733_v13, %v733_v13 }
 0x292   : > { %1021 = vmatmul.msk.bf16.vlgmr.msra.gmra.mxu3 %vm387_vm0, %v737_v14 }
 0x29d   : > { %v723_v16 = vpop.permute.xlu0 %722 }
 0x29e   : > { %v732_v17 = vmul.f32 %v723_v16, %v700_v15 }
 0x29f   : > { %v718_v19 = vpop.permute.xlu2 %717 }
 0x2a0   : > { %v736_v20 = vpack.c.bf16 %v732_v17, %v732_v17  ;;  %v731_v21 = vmul.f32 %v718_v19, %v699_v18 }
 0x2a2   : > { %v735_v22 = vpack.c.bf16 %v731_v21, %v731_v21  ;;  %1020 = vmatmul.msk.bf16.vlgmr.msra.gmra.mxu2 %vm387_vm0, %v736_v20 }
 0x2a4   : > { %1019 = vmatmul.msk.bf16.vlgmr.msra.gmra.mxu1 %vm387_vm0, %v735_v22 }
 0x2af   : > { %v713_v24 = vpop.permute.xlu1 %712 }
 0x2b0   : > { %v730_v25 = vmul.f32 %v713_v24, %v698_v23 }
 0x2b2   : > { %v734_v26 = vpack.c.bf16 %v730_v25, %v730_v25 }
 0x2b4   : > { %1018 = vmatmul.msk.bf16.vlgmr.msra.gmra.mxu0 %vm387_vm0, %v734_v26 }
 0x315   : > { %v814_v27 = vpop.f32.mrf.mxu3 }
 0x316   : > { %v824_v40 = vsel %vm818_vm3, %v814_v27, 0.0 }
 0x31d   : > { %v816_v28 = vpop.f32.mrf.mxu3 }
 0x321   : > { %v776_v29 = vpop.f32.mrf.mxu1 }
 0x322   : > { %v820_v34 = vsel %vm818_vm3, %v776_v29, 0.0 }
 0x325   : > { %v795_v30 = vpop.f32.mrf.mxu2 }
 0x326   : > { %v822_v37 = vsel %vm818_vm3, %v795_v30, 0.0 }
 0x329   : > { %v778_v31 = vpop.f32.mrf.mxu1 }
 0x32d   : > { %v797_v32 = vpop.f32.mrf.mxu2 }
 0x331   : > { %v757_v33 = vpop.f32.mrf.mxu0 }
 0x332   : > { %v819_v35 = vsel %vm818_vm3, %v757_v33, 0.0 }
 0x333   : > { %v821_v36 = vadd.f32 %v820_v34, %v819_v35 }
 0x335   : > { %v823_v38 = vadd.f32 %v822_v37, %v821_v36 }
 0x337   : > { %v825_v41 = vadd.f32 %v824_v40, %v823_v38 }
 0x339   : > { %v830_v42 = vadd.f32 %v1120_v39, %v825_v41  ;;  %v759_v43 = vpop.f32.mrf.mxu0 }
 0x33b   : > { %831 = vst.msk [vmem:[%s372_s21] sm:$0xff] %vm818_vm3, %v830_v42 }
 0x33c   : > { %1292 = shalt.err (!%p1289_p13)
}
 0x33d   : > { %1039 = dma.vmem_to_hbm [thread:$0]  (%p1484_p0), %s847_s25, 128, %s849_s13, %s833_s27  }
 0x33e PF: > { %s860_s1 = sand.u32 1, %s1335_s18   ;;  %p1056_p3 = pnand %p994_p4, %p1488_p2 }
 0x33f   : > { %s861_s3 = scalar_lea.sflag [#allocation7], %s860_s1 }
 0x340   : > { %p1057_p5 = pneg %p1056_p3 }
 0x342   : > { %1330 = dma.done.wait (%p1057_p5), %s861_s3, 128  }
 0x343   : > { %1332 = vsyncadd (%p1057_p5), %s861_s3, 4294967168  ;;  %s25_s23 = sadd.s32 1, %s1355_s23   ;;  %s1741_s24 = sld [smem:[#allocation20_spill]] }
 0x344   : > { %p22_p1 = scmp.ge.s32.totalorder %s25_s23, 4   ;;  %s1742_s21 = sld [smem:[#allocation18_spill]] }
 0x345   : > { %s1743_s22 = sld [smem:[#allocation19_spill]]  ;;  %s1744_s18 = smov %s1339_s19 }
 0x346   : > { %s1745_s19 = smov %s1343_s20  ;;  %24 = sbr.rel (!%p22_p1) target bundleno = 13 (0xd), region = 121 }
 0x349   : > { %s1746_s20 = smov %s1741_s24 }
 0x34b   :  { %867 = vsyncpa [#allocation6], 1 }
 0x34c   :  { %869 = vsyncpa [#allocation6 + $0x1], 1 }
 0x34d   :  { %870 = vsyncpa [#allocation9], 1 }
 0x34e   :  { %872 = vsyncpa [#allocation9 + $0x1], 1 }
 0x34f   :  { %873 = vsyncpa [#allocation12], 1 }
 0x350   :  { %874 = vsyncpa [#allocation7], 1 }
 0x351   :  { %876 = vsyncpa [#allocation7 + $0x1], 1 }

</bundles_post_ra>
